<compile_context>
chip_gen: v7x
topology: tpu7x:2x2x1
jax: 0.10.0
libtpu: 0.0.40
codegen_flags: <defaults>
</compile_context>

<pallas_src>
import math

import jax
import jax.numpy as jnp
from jax.experimental import pallas as pl
from jax.experimental.pallas import tpu as pltpu


def _layer_scale_kernel(x_ref, gamma_ref, o_ref):
    # x_ref: (block_rows, tn), gamma_ref: (1, tn) -> broadcasts over sublanes.
    o_ref[...] = (x_ref[...] * gamma_ref[...]).astype(o_ref.dtype)


def _round_down_to(a, b):
    return (a // b) * b


def layer_scale(x, gamma, *, inplace=False, target_tile_bytes=4 * 1024 * 1024):
    """out = x * gamma.  x: (..., dim); gamma: (dim,)."""
    orig_shape = x.shape
    dim = orig_shape[-1]
    assert gamma.shape == (dim,), f"gamma shape {gamma.shape} != ({dim},)"

    # Cast gamma once so the in-kernel multiply stays in x's dtype
    # (keeps HBM traffic at bf16 width for bf16 activations).
    gamma = gamma.astype(x.dtype)

    x2 = x.reshape(-1, dim)
    rows = x2.shape[0]

    # ---- Lane-dense packing: make the last axis a multiple of 128 ----------
    feat = dim
    g = gamma
    if dim % 128 != 0:
        k = 128 // math.gcd(dim, 128)
        if rows % k == 0:
            feat = dim * k
            rows = rows // k
            x2 = x2.reshape(rows, feat)
            g = jnp.tile(gamma, k)
        # else: fall back to un-packed layout (masked stores) -- still correct.

    dtype_bytes = jnp.dtype(x.dtype).itemsize
    sublane = {4: 8, 2: 16, 1: 32}.get(dtype_bytes, 8)

    # ---- Feature-axis tile (multiple of 128, or full extent) ---------------
    if feat % 128 == 0:
        tn = feat
        max_tn = 4096
        if feat > max_tn:
            tn = 128
            for cand in range(max_tn, 127, -128):
                if feat % cand == 0:
                    tn = cand
                    break
    else:
        tn = feat  # full extent is allowed even when not a multiple of 128

    # ---- Row-axis tile sized against the VMEM budget ------------------------
    row_bytes = tn * dtype_bytes
    block_rows = max(sublane, _round_down_to(target_tile_bytes // row_bytes, sublane))
    if rows <= block_rows:
        block_rows = rows  # single (budget-sized) block; full-extent is allowed

    grid = (pl.cdiv(rows, block_rows), feat // tn)

    # x + out double-buffered (~4 tiles) plus gamma and slack; always at least
    # 32 MiB so v5e's 16 MiB scoped default never caps the tile size, and
    # capped at 48 MiB to stay inside v7x's 64 MiB physical VMEM.
    tile_bytes = block_rows * tn * dtype_bytes
    vmem_limit = int(min(48 * 1024 * 1024, max(32 * 1024 * 1024, 6 * tile_bytes)))

    g2 = g.reshape(1, feat)

    out = pl.pallas_call(
        _layer_scale_kernel,
        out_shape=jax.ShapeDtypeStruct((rows, feat), x.dtype),
        grid_spec=pltpu.PrefetchScalarGridSpec(
            num_scalar_prefetch=0,
            grid=grid,
            in_specs=[
                pl.BlockSpec((block_rows, tn), lambda i, j: (i, j)),
                pl.BlockSpec((1, tn), lambda i, j: (0, j)),
            ],
            out_specs=pl.BlockSpec((block_rows, tn), lambda i, j: (i, j)),
        ),
        compiler_params=pltpu.CompilerParams(
            dimension_semantics=("parallel", "parallel"),
            vmem_limit_bytes=vmem_limit,
        ),
        # Mirrors the PyTorch `inplace` flag: reuse x's HBM buffer for the out.
        input_output_aliases={0: 0} if inplace else {},
    )(x2, g2)

    return out.reshape(orig_shape)


if __name__ == "__main__":
    init_values = 1e-5
    key = jax.random.PRNGKey(0)
    k1, k2, k3 = jax.random.split(key, 3)

    # Case 1: typical LayerScale usage, dim NOT a multiple of 128
    # (exercises the lane-dense re-packing path).
    batch, seq, dim = 2, 8, 32
    x = jax.random.normal(k1, (batch, seq, dim), dtype=jnp.float32)
    gamma = init_values * jnp.ones((dim,), dtype=jnp.float32)
    out = jax.block_until_ready(layer_scale(x, gamma))
    ref = x * gamma
    assert out.shape == x.shape and out.dtype == x.dtype
    assert jnp.allclose(out, ref, atol=1e-6, rtol=1e-6)

    # Case 2: lane-aligned dim with a multi-step, ragged row grid
    # (small tile budget to force grid > 1 at these small test shapes).
    batch, seq, dim = 2, 36, 256  # rows = 72 -> 5 blocks of 16, last one ragged
    x = jax.random.normal(k2, (batch, seq, dim), dtype=jnp.float32)
    gamma = init_values * jnp.ones((dim,), dtype=jnp.float32)
    out = jax.block_until_ready(layer_scale(x, gamma, target_tile_bytes=16 * 256 * 4))
    ref = x * gamma
    assert jnp.allclose(out, ref, atol=1e-6, rtol=1e-6)

    # Case 3: bf16 activations with f32 gamma (mixed-precision caller).
    batch, seq, dim = 2, 8, 32
    x = jax.random.normal(k3, (batch, seq, dim), dtype=jnp.bfloat16)
    gamma = init_values * jnp.ones((dim,), dtype=jnp.float32)
    out = jax.block_until_ready(layer_scale(x, gamma))
    ref = x * gamma.astype(jnp.bfloat16)
    assert out.dtype == jnp.bfloat16
    assert jnp.allclose(out.astype(jnp.float32), ref.astype(jnp.float32),
                        atol=1e-2, rtol=1e-2)

    print("KERNEL_OK")
</pallas_src>

<mosaic_0001>
module attributes {stable_mosaic.version = 11 : i64} {
  func.func @_layer_scale_kernel(%arg0: i32, %arg1: i32, %arg2: memref<4x128xf32, #tpu.memory_space<vmem>>, %arg3: memref<1x128xf32, #tpu.memory_space<vmem>>, %arg4: memref<4x128xf32, #tpu.memory_space<vmem>>) attributes {dimension_semantics = [#tpu.dimension_semantics<parallel>, #tpu.dimension_semantics<parallel>], iteration_bounds = array<i64: 1, 1>, scalar_prefetch = 0 : i64, scratch_operands = 0 : i64, tpu.core_type = #tpu.core_type<tc>, window_params = [{transform_indices = @transform_0, window_bounds = array<i64: 4, 128>}, {transform_indices = @transform_1, window_bounds = array<i64: 1, 128>}, {transform_indices = @transform_2, window_bounds = array<i64: 4, 128>}]} {
    %c0 = arith.constant 0 : index
    %c0_0 = arith.constant 0 : index
    %0 = vector.load %arg2[%c0, %c0_0] : memref<4x128xf32, #tpu.memory_space<vmem>>, vector<4x128xf32>
    %c0_1 = arith.constant 0 : index
    %c0_2 = arith.constant 0 : index
    %1 = vector.load %arg3[%c0_1, %c0_2] : memref<1x128xf32, #tpu.memory_space<vmem>>, vector<1x128xf32>
    %2 = vector.broadcast %1 : vector<1x128xf32> to vector<4x128xf32>
    %3 = arith.mulf %0, %2 : vector<4x128xf32>
    %c0_3 = arith.constant 0 : index
    %c0_4 = arith.constant 0 : index
    %4 = vector.load %arg4[%c0_3, %c0_4] : memref<4x128xf32, #tpu.memory_space<vmem>>, vector<4x128xf32>
    tpu.vector_store %arg4[%c0_3, %c0_4], %3 {strides = array<i32>} : memref<4x128xf32, #tpu.memory_space<vmem>>, vector<4x128xf32>,
    return
  }
  func.func @transform_0(%arg0: i32, %arg1: i32) -> (i32, i32) {
    %c0_i32 = arith.constant 0 : i32
    return %arg0, %arg1 : i32, i32
  }
  func.func @transform_1(%arg0: i32, %arg1: i32) -> (i32, i32) {
    %c0_i32 = arith.constant 0 : i32
    %c0_i32_0 = arith.constant 0 : i32
    return %c0_i32, %arg1 : i32, i32
  }
  func.func @transform_2(%arg0: i32, %arg1: i32) -> (i32, i32) {
    %c0_i32 = arith.constant 0 : i32
    return %arg0, %arg1 : i32, i32
  }
}

</mosaic_0001>

<bundles_post_ra>
// kernel: tpu_custom_call.1
= control target key start
LH: loop header
LB: loop body
LE: loop exit
PB: predicated region body
PF: predicated region fallthrough
CT: control target
= control target key end

     0   :  { %7 = vsyncpa [#allocation3], 0  ;;  %s144_s0 = inlined_call_operand.hbm [shape: f32[4,128], index: 0, kind: input, shape index: {}]   ;;  %s145_s1 = inlined_call_operand.vmem [shape: f32[1,128], index: 1, kind: input, shape index: {}]   ;;  %s146_s2 = inlined_call_operand.hbm [shape: f32[4,128], index: 2, kind: output, shape index: {}]  }
   0x1   :  { %8 = vsyncpa [#allocation4], 0  ;;  %s100_s9 = smov [#allocation2]   ;;  %s52_s13 = scalar_lea.hbm %s144_s0, 64 }
   0x2   :  { %s15_s10 = sshll.u32 %s100_s9, 4  ;;  %p53_p0 = scmp.ne.s32.totalorder %s144_s0, %s52_s13  ;;  %s16_s10 = int_to_ptr.vmem [resolvable:$true] %s15_s10 }
   0x3   :  { %p56_p1 = scmp.lt.u32.totalorder %s52_s13, %s144_s0 }
   0x5   :  { %p58_p2 = pnand %p56_p1, %p53_p0 }
   0x7   :  { %61 = shalt.err (!%p58_p2)
}
   0x8   :  { %s62_s18 = scalar_lea.vmem %s16_s10, 64  ;;  %p67_p4 = scmp.lt.s32.totalorder %s16_s10, %s16_s10 }
   0x9   :  { %p63_p3 = scmp.ne.s32.totalorder %s16_s10, %s62_s18  ;;  %p68_p5 = scmp.lt.s32.totalorder %s62_s18, %s62_s18 }
   0xb   :  { %p69_p6 = por %p68_p5, %p67_p4 }
   0xd   :  { %p70_p7 = pnand %p69_p6, %p63_p3 }
   0xf   :  { %73 = shalt.err (!%p70_p7)
}
  0x10   :  { %18 = dma.hbm_to_vmem [thread:$0]  %s144_s0, 64, %s16_s10, [#allocation3]  }
  0x11   :  { %96 = dma.done.wait [#allocation3], 64  }
  0x12   :  { %97 = vsyncadd [#allocation3], 4294967232  ;;  %s101_s21 = smov [#allocation5]   ;;  %v24_v0 = vld [vmem:[#allocation2] sm:$0xf] }
  0x13   :  { %s40_s22 = sshll.u32 %s101_s21, 4  ;;  %v49_v1 = vld [vmem:[%s145_s1] ss:$0 sm:$0xff]  ;;  %s41_s22 = int_to_ptr.vmem [resolvable:$true] %s40_s22 }
  0x14   :  { %v32_v2 = vmul.f32 %v49_v1, %v24_v0  ;;  %s74_s25 = scalar_lea.vmem %s41_s22, 64  ;;  %p79_p9 = scmp.lt.s32.totalorder %s41_s22, %s41_s22 }
  0x15   :  { %p75_p8 = scmp.ne.s32.totalorder %s41_s22, %s74_s25  ;;  %p80_p10 = scmp.lt.s32.totalorder %s74_s25, %s74_s25 }
  0x16   :  { %33 = vst [vmem:[#allocation5] sm:$0xf] %v32_v2 }
  0x17   :  { %p81_p11 = por %p80_p10, %p79_p9 }
  0x19   :  { %p82_p12 = pnand %p81_p11, %p75_p8 }
  0x1b   :  { %85 = shalt.err (!%p82_p12)
}
  0x1c   :  { %s86_s27 = scalar_lea.hbm %s146_s2, 64 }
  0x1d   :  { %p87_p13 = scmp.ne.s32.totalorder %s146_s2, %s86_s27  ;;  %p90_p0 = scmp.lt.u32.totalorder %s86_s27, %s146_s2 }
  0x1f   :  { %p92_p1 = pnand %p90_p0, %p87_p13 }
  0x21   :  { %95 = shalt.err (!%p92_p1)
}
  0x22   :  { %43 = dma.vmem_to_hbm [thread:$0]  %s41_s22, 64, %s146_s2, [#allocation4]  }
  0x23   :  { %98 = dma.done.wait [#allocation4], 64  }
  0x24   :  { %99 = vsyncadd [#allocation4], 4294967232 }
  0x25   :  { %47 = vsyncpa [#allocation3], 1 }
  0x26   :  { %48 = vsyncpa [#allocation4], 1 }

</bundles_post_ra>
